<compile_context>
chip_gen: v6e
topology: v6e:2x2x1
jax: 0.10.0
libtpu: 0.0.40
codegen_flags: <defaults>
</compile_context>

<pallas_src>
import functools

import jax
import jax.numpy as jnp
from jax import lax
from jax.experimental import pallas as pl
from jax.experimental.pallas import tpu as pltpu


def _round_up(x, m):
    return ((x + m - 1) // m) * m


def _sublane_pack(dtype):
    # dtype-native sublane packing: 8 rows for 32-bit, 16 for bf16, 32 for int8/fp8.
    return max(8, 32 // jnp.dtype(dtype).itemsize)


def _vmem_budget_bytes():
    # Generation-aware budget (~96 MiB on v5e/v6e, ~48 MiB on v7x).
    try:
        cap = int(pltpu.get_tpu_info().vmem_capacity_bytes)
    except Exception:
        cap = 0
    if cap <= 0:
        cap = 64 << 20  # conservative fallback (v7x per-TC VMEM)
    return (cap * 3) // 4


def _maybe_single_buffered(block_shape, index_map, single_buffer):
    # Constant-index operands don't need double buffering; only override when the
    # VMEM saving is meaningful (and fall back gracefully if unsupported).
    if single_buffer:
        try:
            return pl.BlockSpec(block_shape, index_map, pipeline_mode=pl.Buffered(1))
        except Exception:
            pass
    return pl.BlockSpec(block_shape, index_map)


def _choose_tm(m, per_row_bytes, resident_bytes, budget, pack):
    avail = budget - resident_bytes
    tm = avail // per_row_bytes if avail > 0 else pack
    tm = min(int(tm), 1024)
    # Keep >= 2 row tiles when possible so the "parallel" axis can shard across
    # both v7x TensorCores.
    tm = min(tm, _round_up(pl.cdiv(m, 2), pack))
    tm = max(tm, pack)
    if tm >= m:
        return m  # single full-extent block (exempt from the sublane-multiple rule)
    return max(pack, (tm // pack) * pack)


# ----------------------------------------------------------------------------- #
# Resident-W path: W.T and bias stay in VMEM, x/out row tiles are streamed.
# ----------------------------------------------------------------------------- #
def _resident_kernel(x_ref, wt_ref, b_ref, o_ref):
    x = x_ref[...]
    y = jnp.dot(x, wt_ref[...], preferred_element_type=jnp.float32)
    o_ref[...] = (
        x.astype(jnp.float32) + y + b_ref[...].astype(jnp.float32)
    ).astype(o_ref.dtype)


# ----------------------------------------------------------------------------- #
# K/N-tiled fallback (P3 accumulator) for W too large to keep VMEM-resident.
# Square tiles along H (t_k == t_n) so the residual x columns for output block j
# are exactly the x K-block with k == j.
# ----------------------------------------------------------------------------- #
def _tiled_kernel(x_ref, wt_ref, b_ref, o_ref, acc_ref, *, h, t):
    j = pl.program_id(1)
    k = pl.program_id(2)

    @pl.when(k == 0)
    def _init():
        acc_ref[...] = jnp.zeros_like(acc_ref)

    x = x_ref[...]
    w = wt_ref[...]
    if h % t != 0:
        # Ragged K tail: zero the padded lanes of x and padded sublanes of W so
        # undefined VMEM never reaches the accumulator. (Garbage confined to
        # OOB output rows/cols is dropped by the clipped writeback.)
        kcol = k * t + lax.broadcasted_iota(jnp.int32, x.shape, 1)
        x = jnp.where(kcol < h, x, jnp.zeros_like(x))
        krow = k * t + lax.broadcasted_iota(jnp.int32, w.shape, 0)
        w = jnp.where(krow < h, w, jnp.zeros_like(w))

    acc_ref[...] += jnp.dot(x, w, preferred_element_type=jnp.float32)

    @pl.when(k == j)
    def _residual():  # add skip connection + bias exactly once per (i, j)
        acc_ref[...] += x.astype(jnp.float32) + b_ref[...].astype(jnp.float32)

    @pl.when(k == pl.num_programs(2) - 1)
    def _store():
        o_ref[...] = acc_ref[...].astype(o_ref.dtype)


@functools.partial(jax.jit, static_argnames=("force_tiled",))
def skip_connection_linear(data, weight, bias, *, force_tiled=False):
    """data: [B, S, H]; weight: [H, H] (PyTorch Linear layout, out x in); bias: [H]."""
    B, S, H = data.shape
    M = B * S
    dtype = data.dtype
    itemsize = jnp.dtype(dtype).itemsize
    pack = _sublane_pack(dtype)
    budget = _vmem_budget_bytes()

    x2d = data.reshape(M, H)
    # One-time (in, out) layout so the kernel contracts on W's dim 0 — avoids a
    # per-grid-step XLU transpose of the full weight tile.
    wt = weight.T
    b2d = bias.reshape(1, H)

    cost = pl.CostEstimate(
        flops=2 * M * H * H + 2 * M * H,
        bytes_accessed=(2 * M * H + H * H + H) * itemsize,
        transcendentals=0,
    )

    w_bytes = H * H * itemsize
    single_buffer_w = w_bytes >= (2 << 20)
    w_resident_bytes = w_bytes * (1 if single_buffer_w else 2) + 2 * H * itemsize
    resident_ok = (not force_tiled) and (
        w_resident_bytes + 4 * min(_round_up(M, pack), 128) * H * itemsize + (1 << 20)
        <= budget
    )

    if resident_ok:
        tm = _choose_tm(M, 4 * H * itemsize, w_resident_bytes, budget, pack)
        out2d = pl.pallas_call(
            _resident_kernel,
            out_shape=jax.ShapeDtypeStruct((M, H), dtype),
            grid_spec=pltpu.PrefetchScalarGridSpec(
                num_scalar_prefetch=0,
                grid=(pl.cdiv(M, tm),),
                in_specs=[
                    pl.BlockSpec((tm, H), lambda i: (i, 0)),  # x row tile (streamed)
                    _maybe_single_buffered((H, H), lambda i: (0, 0), single_buffer_w),
                    _maybe_single_buffered((1, H), lambda i: (0, 0), single_buffer_w),
                ],
                out_specs=pl.BlockSpec((tm, H), lambda i: (i, 0)),
            ),
            compiler_params=pltpu.CompilerParams(
                dimension_semantics=("parallel",),
                vmem_limit_bytes=budget,
            ),
            cost_estimate=cost,
        )(x2d, wt, b2d)
    else:
        t = H if H <= 128 else (128 if H < 256 else (256 if H < 1024 else 512))
        per_row = 4 * t * itemsize + 4 * t          # 2x-buffered x/out tiles + f32 acc
        resident = 2 * t * t * itemsize + 2 * t * itemsize
        tm = _choose_tm(M, per_row, resident, budget, pack)
        nt = pl.cdiv(H, t)
        out2d = pl.pallas_call(
            functools.partial(_tiled_kernel, h=H, t=t),
            out_shape=jax.ShapeDtypeStruct((M, H), dtype),
            grid_spec=pltpu.PrefetchScalarGridSpec(
                num_scalar_prefetch=0,
                grid=(pl.cdiv(M, tm), nt, nt),
                in_specs=[
                    pl.BlockSpec((tm, t), lambda i, j, k: (i, k)),  # x
                    pl.BlockSpec((t, t), lambda i, j, k: (k, j)),   # W.T
                    pl.BlockSpec((1, t), lambda i, j, k: (0, j)),   # bias
                ],
                out_specs=pl.BlockSpec((tm, t), lambda i, j, k: (i, j)),
                scratch_shapes=[pltpu.VMEM((tm, t), jnp.float32)],
            ),
            compiler_params=pltpu.CompilerParams(
                dimension_semantics=("parallel", "parallel", "arbitrary"),
                vmem_limit_bytes=budget,
            ),
            cost_estimate=cost,
        )(x2d, wt, b2d)

    return out2d.reshape(B, S, H)


def skip_connection_linear_forward(input_dict, weight, bias):
    """Mirrors SkipConnection_Linear.forward: dict in, dict out."""
    return {
        "data": skip_connection_linear(input_dict["data"], weight, bias),
        "mask": input_dict["mask"],
        "graph_size": input_dict["graph_size"],
    }


if __name__ == "__main__":
    root = jax.random.PRNGKey(0)

    def make_case(key, B, S, H):
        kd, kw, kb = jax.random.split(key, 3)
        data = jax.random.normal(kd, (B, S, H), dtype=jnp.float32)
        bound = 1.0 / (H ** 0.5)
        weight = jax.random.uniform(kw, (H, H), minval=-bound, maxval=bound, dtype=jnp.float32)
        bias = jax.random.uniform(kb, (H,), minval=-bound, maxval=bound, dtype=jnp.float32)
        return data, weight, bias

    def reference(data, weight, bias):
        y = jnp.einsum("bsh,oh->bso", data, weight, precision=jax.lax.Precision.HIGHEST)
        return data + y + bias

    k0, k1, k2 = jax.random.split(root, 3)

    # 1) Main demo: resident-W path (B=2, S=8, H=32), full forward dict.
    data, weight, bias = make_case(k0, 2, 8, 32)
    mask = jnp.zeros((2, 8), dtype=jnp.bool_)
    graph_size = jnp.array(8, dtype=jnp.int32)
    out = skip_connection_linear_forward(
        {"data": data, "mask": mask, "graph_size": graph_size}, weight, bias
    )
    jax.block_until_ready(out["data"])
    assert jnp.allclose(out["data"], reference(data, weight, bias), atol=1e-3, rtol=1e-3)
    assert out["mask"].shape == mask.shape
    assert int(out["graph_size"]) == 8

    # 2) Ragged row count (M=5 not a sublane multiple) on the resident path.
    d2, w2, b2 = make_case(k1, 1, 5, 32)
    o2 = skip_connection_linear(d2, w2, b2)
    jax.block_until_ready(o2)
    assert jnp.allclose(o2, reference(d2, w2, b2), atol=1e-3, rtol=1e-3)

    # 3) K/N-tiled fallback path with ragged K/N tiles (H=200, not a 128 multiple).
    d3, w3, b3 = make_case(k2, 2, 8, 200)
    o3 = skip_connection_linear(d3, w3, b3, force_tiled=True)
    jax.block_until_ready(o3)
    assert jnp.allclose(o3, reference(d3, w3, b3), atol=1e-3, rtol=1e-3)

    print("KERNEL_OK")
</pallas_src>

<mosaic_0001>
module attributes {stable_mosaic.version = 11 : i64} {
  func.func @_resident_kernel(%arg0: i32, %arg1: memref<8x32xf32, #tpu.memory_space<vmem>>, %arg2: memref<32x32xf32, #tpu.memory_space<vmem>>, %arg3: memref<1x32xf32, #tpu.memory_space<vmem>>, %arg4: memref<8x32xf32, #tpu.memory_space<vmem>>) attributes {dimension_semantics = [#tpu.dimension_semantics<parallel>], iteration_bounds = array<i64: 2>, scalar_prefetch = 0 : i64, scratch_operands = 0 : i64, tpu.core_type = #tpu.core_type<tc>, window_params = [{transform_indices = @transform_0, window_bounds = array<i64: 8, 32>}, {pipeline_mode = #tpu.pipeline_mode<synchronous>, transform_indices = @transform_1, window_bounds = array<i64: 32, 32>}, {pipeline_mode = #tpu.pipeline_mode<synchronous>, transform_indices = @transform_2, window_bounds = array<i64: 1, 32>}, {transform_indices = @transform_3, window_bounds = array<i64: 8, 32>}]} {
    %c0 = arith.constant 0 : index
    %c0_0 = arith.constant 0 : index
    %0 = vector.load %arg1[%c0, %c0_0] : memref<8x32xf32, #tpu.memory_space<vmem>>, vector<8x32xf32>
    %c0_1 = arith.constant 0 : index
    %c0_2 = arith.constant 0 : index
    %1 = vector.load %arg2[%c0_1, %c0_2] : memref<32x32xf32, #tpu.memory_space<vmem>>, vector<32x32xf32>
    %cst = arith.constant dense<0.000000e+00> : vector<8x32xf32>
    %2 = tpu.matmul %0, %1, %cst {dimension_numbers = #tpu.dot_dimension_numbers<[1], [0], [0], [1], [0, 0, 1, 1], [], []>} : vector<8x32xf32>, vector<32x32xf32>, vector<8x32xf32> -> vector<8x32xf32>
    %3 = arith.addf %0, %2 : vector<8x32xf32>
    %c0_3 = arith.constant 0 : index
    %c0_4 = arith.constant 0 : index
    %4 = vector.load %arg3[%c0_3, %c0_4] : memref<1x32xf32, #tpu.memory_space<vmem>>, vector<1x32xf32>
    %5 = vector.broadcast %4 : vector<1x32xf32> to vector<8x32xf32>
    %6 = arith.addf %3, %5 : vector<8x32xf32>
    %c0_5 = arith.constant 0 : index
    %c0_6 = arith.constant 0 : index
    %7 = vector.load %arg4[%c0_5, %c0_6] : memref<8x32xf32, #tpu.memory_space<vmem>>, vector<8x32xf32>
    tpu.vector_store %arg4[%c0_5, %c0_6], %6 {strides = array<i32>} : memref<8x32xf32, #tpu.memory_space<vmem>>, vector<8x32xf32>,
    return
  }
  func.func @transform_0(%arg0: i32) -> (i32, i32) {
    %c0_i32 = arith.constant 0 : i32
    %c0_i32_0 = arith.constant 0 : i32
    return %arg0, %c0_i32 : i32, i32
  }
  func.func @transform_1(%arg0: i32) -> (i32, i32) {
    %c0_i32 = arith.constant 0 : i32
    %c0_i32_0 = arith.constant 0 : i32
    %c0_i32_1 = arith.constant 0 : i32
    return %c0_i32, %c0_i32_0 : i32, i32
  }
  func.func @transform_2(%arg0: i32) -> (i32, i32) {
    %c0_i32 = arith.constant 0 : i32
    %c0_i32_0 = arith.constant 0 : i32
    %c0_i32_1 = arith.constant 0 : i32
    return %c0_i32, %c0_i32_0 : i32, i32
  }
  func.func @transform_3(%arg0: i32) -> (i32, i32) {
    %c0_i32 = arith.constant 0 : i32
    %c0_i32_0 = arith.constant 0 : i32
    return %arg0, %c0_i32 : i32, i32
  }
}

</mosaic_0001>

<bundles_post_ra>
// kernel: skip_connection_linear.1
= control target key start
LH: loop header
LB: loop body
LE: loop exit
PB: predicated region body
PF: predicated region fallthrough
CT: control target
= control target key end

     0   :  { %8 = vsyncpa [#allocation3], 0  ;;  %s586_s0 = inlined_call_operand.vmem [shape: f32[16,32], index: 0, kind: input, shape index: {}]   ;;  %s587_s1 = inlined_call_operand.vmem [shape: f32[32,32], index: 1, kind: input, shape index: {}]   ;;  %s588_s2 = inlined_call_operand.vmem [shape: f32[1,32], index: 2, kind: input, shape index: {}]   ;;  %s589_s3 = inlined_call_operand.hbm [shape: f32[16,32], index: 3, kind: output, shape index: {}]  }
   0x1   :  { %10 = vsyncpa [#allocation3 + $0x1], 0  ;;  %s482_s12 = smov 0   ;;  %s484_s13 = smov 0  }
   0x2   :  { %s486_s14 = smov 0   ;;  %s488_s15 = smov 0  }
   0x3 LB: > { %s503_s16 = sadd.s32 4294967295, %s457_s15   ;;  %s328_s17 = sadd.s32 4294967294, %s457_s15   ;;  %s457_s15 = sphi %s488_s15, %s595_s15   ;;  %s453_s14 = sphi %s486_s14, %s594_s14   ;;  %s449_s13 = sphi %s484_s13, %s593_s13   ;;  %s445_s12 = sphi %s482_s12, %s592_s12  }
   0x4   : > { %s507_s18 = sadd.s32 1, %s457_s15   ;;  %s91_s19 = sadd.s32 1, %s453_s14 }
   0x5   : > { %s88_s20 = ssub.s32 %s457_s15, %s507_s18  ;;  %p101_p0 = scmp.ne.s32.totalorder %s453_s14, %s449_s13 }
   0x6   : > { %p89_p1 = scmp.eq.s32.totalorder %s88_s20, 0  ;;  %p102_p2 = scmp.eq.s32.totalorder %s503_s16, 1 }
   0x7   : > { %p107_p3 = scmp.ne.s32.totalorder %s449_s13, %s445_s12  ;;  %p108_p4 = scmp.eq.s32.totalorder %s328_s17, 1 }
   0x8   : > { %s518_s21 = scalar_select %p89_p1, %s453_s14, %s91_s19  }
   0x9   : > { %p520_p5 = por %p102_p2, %p101_p0  ;;  %p524_p6 = por %p108_p4, %p107_p3 }
   0xa   : > { %p331_p7 = scmp.ge.s32.totalorder %s457_s15, 1  ;;  %p139_p8 = scmp.lt.s32.totalorder %s457_s15, 3 }
   0xc   : > { %p140_p9 = pnand %p331_p7, %p139_p8 }
   0xd   : > { %p162_p10 = scmp.lt.s32.totalorder (!%p140_p9), %s503_s16, 1  ;;  %s159_s10 = sand.u32 (!%p140_p9), 1, %s449_s13  }
   0xe   : > { %143 = sbr.rel (%p140_p9) target bundleno = 238 (0xee), region = 32  ;;  %s332_s11 = sshll.u32 (!%p140_p9), %s159_s10, 3 }
   0xf   : > { %s337_s20 = sshll.u32 (!%p140_p9), %s503_s16, 7  ;;  %s161_s24 = scalar_lea.vmem (!%p140_p9), [#allocation2], %s332_s11 }
  0x10   : > { %s269_s25 = sshll.u32 (!%p140_p9), %s161_s24, 4  ;;  %s256_s29 = scalar_lea.sflag (!%p140_p9), [#allocation3], %s159_s10  ;;  %s270_s25 = int_to_ptr.vmem [resolvable:$true] %s269_s25 }
  0x11   : > { %s397_s30 = scalar_lea.vmem (!%p140_p9), %s270_s25, 128 }
  0x12   : > { %p398_p11 = scmp.ne.s32.totalorder (!%p140_p9), %s270_s25, %s397_s30 }
  0x13   : > { %v170_v0 = vld [vmem:[%s587_s1 + $0x18] sm:$0xff]  ;;  %v459_v1 = vmov 0.0   ;;  %v169_v2 = vld [vmem:[%s587_s1 + $0x10] sm:$0xff]  ;;  %vm460_vm0 = vmmov 0   ;;  %s163_s28 = scalar_select %p162_p10, %s503_s16, 1  ;;  %v168_v3 = vld [vmem:[%s587_s1 + $0x8] sm:$0xff] }
  0x14   : > { %345 = vmatprep.subr.mxu0 %v459_v1  ;;  %353 = vmatprep.mubr.msk.f32.mxu0 %vm460_vm0, %v459_v1  ;;  %v167_v4 = vld [vmem:[%s587_s1] sm:$0xff]  ;;  %vm171_vm1 = vcmask 261120   ;;  %p399_p12 = pnand %p398_p11, %p520_p5 }
  0x15   : > { %346 = vmatpush3.msra.mxu0 %v170_v0  ;;  %s333_s4 = sshll.u32 %s163_s28, 3  ;;  %v335_v7 = vld [vmem:[%s588_s2] ss:$0 sm:$0xff]  ;;  %s267_s28 = scalar_lea.hbm %s589_s3, %s337_s20 }
  0x16   : > { %347 = vmatprep.subr.mxu0 %v459_v1  ;;  %s165_s9 = scalar_lea.vmem %s586_s0, %s333_s4  ;;  %p400_p13 = pneg %p399_p12 }
  0x17   : > { %348 = vmatpush3.msra.mxu0 %v169_v2  ;;  %v166_v5 = vld [vmem:[%s165_s9] sm:$0xff]  ;;  %s461_s4 = smov [#allocation2]  }
  0x18   : > { %349 = vmatprep.subr.mxu0 %v459_v1  ;;  %s401_s16 = sshll.u32 %s461_s4, 4  ;;  %s402_s16 = int_to_ptr.vmem [resolvable:$false] %s401_s16 }
  0x19   : > { %350 = vmatpush3.msra.mxu0 %v168_v3  ;;  %s403_s5 = scalar_lea.vmem %s402_s16, 256  ;;  %p404_p0 = scmp.lt.s32.totalorder %s270_s25, %s402_s16 }
  0x1a   : > { %351 = vmatprep.subr.mxu0 %v459_v1  ;;  %p405_p1 = scmp.lt.s32.totalorder %s403_s5, %s397_s30 }
  0x1b   : > { %352 = vmatpush3.msra.mxu0 %v167_v4 }
  0x1c   : > { %354 = vmatmul.mubr.msk.f32.vlgmr.msra.gmra.mxu0 %vm171_vm1, %v166_v5  ;;  %p406_p2 = por %p405_p1, %p404_p0 }
  0x1e   : > { %p407_p3 = pnand %p406_p2, %p400_p13 }
  0xdc   : > { %v241_v6 = vpop.f32.mrf.mxu0 }
  0xdd   : > { %v245_v8 = vadd.f32 %v241_v6, %v166_v5 }
  0xde   : > { %v355_v9 = vpop.f32.mrf.mxu0 }
  0xdf   : > { %v253_v10 = vadd.f32 %v335_v7, %v245_v8 }
  0xe1   : > { %254 = vst.msk [vmem:[%s161_s24] sm:$0xff] %vm171_vm1, %v253_v10 }
  0xe2   : > { %410 = shalt.err (!%p407_p3)
}
  0xe3   : > { %s411_s6 = scalar_lea.hbm %s267_s28, 128  ;;  %s415_s9 = scalar_lea.hbm %s589_s3, 256 }
  0xe4   : > { %p412_p4 = scmp.ne.s32.totalorder %s267_s28, %s411_s6  ;;  %p416_p9 = scmp.lt.s32.totalorder %s267_s28, %s589_s3 }
  0xe5   : > { %p417_p10 = scmp.lt.s32.totalorder %s415_s9, %s411_s6 }
  0xe6   : > { %p413_p7 = pnand %p412_p4, %p520_p5 }
  0xe7   : > { %p418_p11 = por %p417_p10, %p416_p9 }
  0xe8   : > { %p414_p8 = pneg %p413_p7 }
  0xea   : > { %p419_p12 = pnand %p418_p11, %p414_p8 }
  0xec   : > { %422 = shalt.err (!%p419_p12)
}
  0xed   : > { %356 = dma.vmem_to_hbm [thread:$0]  (%p520_p5), %s270_s25, 128, %s267_s28, %s256_s29  }
  0xee PF: > { %p362_p13 = scmp.ge.s32.totalorder %s457_s15, 2  ;;  %s281_s17 = sand.u32 1, %s445_s12  }
  0xef   : > { %s282_s19 = scalar_lea.sflag [#allocation3], %s281_s17 }
  0xf0   : > { %p359_p0 = pnand %p362_p13, %p524_p6 }
  0xf2   : > { %p360_p1 = pneg %p359_p0 }
  0xf4   : > { %440 = dma.done.wait (%p360_p1), %s282_s19, 128  }
  0xf5   : > { %442 = vsyncadd (%p360_p1), %s282_s19, 4294967168  ;;  %p13_p2 = scmp.ge.s32.totalorder %s507_s18, 4   ;;  %s592_s12 = smov %s449_s13 }
  0xf6   : > { %s593_s13 = smov %s453_s14  ;;  %s594_s14 = smov %s518_s21 }
  0xf7   : > { %s595_s15 = smov %s507_s18  ;;  %15 = sbr.rel (!%p13_p2) target bundleno = 3 (0x3), region = 67 }
  0xfc   :  { %287 = vsyncpa [#allocation3], 1 }
  0xfd   :  { %289 = vsyncpa [#allocation3 + $0x1], 1 }

</bundles_post_ra>
